<compile_context>
chip_gen: v6e
topology: v6e:2x2x1
jax: 0.10.0
libtpu: 0.0.40
codegen_flags: <defaults>
</compile_context>

<pallas_src>
import functools

import jax
import jax.numpy as jnp
from jax.experimental import pallas as pl
from jax.experimental.pallas import tpu as pltpu


def _nll_sum_kernel(inp_ref, tgt_ref, out_ref, acc_ref, *,
                    total_n: int, tile_n: int, tiles_per_part: int):
    """Accumulates sum_r input[r, target[r]] over this partial's row tiles."""
    p = pl.program_id(0)                      # partial (TensorCore) index
    i = pl.program_id(1)                      # row-tile index within partial

    @pl.when(i == 0)
    def _():
        acc_ref[...] = jnp.zeros_like(acc_ref)

    x = inp_ref[...].astype(jnp.float32)      # (tile_n, C) f32
    tgt = tgt_ref[...]                        # (tile_n, 1) int32
    tn, c = x.shape

    col = jax.lax.broadcasted_iota(jnp.int32, (tn, c), 1)
    row = jax.lax.broadcasted_iota(jnp.int32, (tn, c), 0)
    global_row = (p * tiles_per_part + i) * tile_n + row
    # One-hot select of input[r, target[r]].  Rows past the real N (tile tail
    # padding, or clamped overhang tiles of the last partial) are masked out,
    # so padded/garbage targets can never contribute to the sum.
    valid = (global_row < total_n) & (col == tgt)
    acc_ref[...] += jnp.sum(jnp.where(valid, x, jnp.float32(0.0)))

    @pl.when(i == pl.num_programs(1) - 1)
    def _():
        # Every element of acc holds the running partial sum; write the block.
        out_ref[...] = acc_ref[...].reshape(1, 8, 128)


def elbo_forward(input_logp, target, kl, kl_weight=0.1, *, train_size):
    """Returns (likelihood_loss, kl_loss) matching the PyTorch ELBO.forward.

    input_logp: (N, C) log-probabilities (f32 or bf16), target: (N,) int class
    indices, kl: scalar.
    """
    # TODO(synk): NLLLoss ignore_index / per-class weights are not implemented
    # (the reference module never passes them).
    n, c = input_logp.shape
    itemsize = jnp.dtype(input_logp.dtype).itemsize
    sublane = 8 if itemsize >= 4 else 16          # bf16 min tile is (16, 128)
    tile_n = min(512, max(sublane, pl.cdiv(n, sublane) * sublane))
    n_tiles = pl.cdiv(n, tile_n)

    num_partials = 2                              # dual TensorCore on v7x
    tiles_per_part = pl.cdiv(n_tiles, num_partials)

    tgt2d = target.astype(jnp.int32).reshape(n, 1)

    def row_block(pi, ii):
        # Clamp so overhang tiles of the last partial stay in-bounds; their
        # rows are masked out inside the kernel via the global-row check.
        return (jnp.minimum(pi * tiles_per_part + ii, n_tiles - 1), 0)

    kernel = functools.partial(
        _nll_sum_kernel, total_n=n, tile_n=tile_n,
        tiles_per_part=tiles_per_part)

    partials = pl.pallas_call(
        kernel,
        out_shape=jax.ShapeDtypeStruct((num_partials, 8, 128), jnp.float32),
        grid_spec=pltpu.PrefetchScalarGridSpec(
            num_scalar_prefetch=0,
            grid=(num_partials, tiles_per_part),
            in_specs=[
                pl.BlockSpec((tile_n, c), row_block),     # log-prob row tile
                pl.BlockSpec((tile_n, 1), row_block),     # target row tile
            ],
            out_specs=pl.BlockSpec((1, 8, 128), lambda pi, ii: (pi, 0, 0)),
            scratch_shapes=[pltpu.VMEM((8, 128), jnp.float32)],
        ),
        compiler_params=pltpu.CompilerParams(
            dimension_semantics=("parallel", "arbitrary")),
        cost_estimate=pl.CostEstimate(
            flops=2 * n * c,
            transcendentals=0,
            bytes_accessed=n * c * itemsize + n * 4
            + num_partials * 8 * 128 * 4),
    )(input_logp, tgt2d)

    picked_sum = jnp.sum(partials[:, 0, 0])       # combine per-core partials
    likelihood_loss = -(picked_sum / jnp.float32(n)) * jnp.float32(train_size)
    kl_loss = jnp.float32(kl_weight) * jnp.asarray(kl, jnp.float32)
    return likelihood_loss, kl_loss


if __name__ == "__main__":
    key = jax.random.PRNGKey(0)
    k1, k2, k3 = jax.random.split(key, 3)

    N, C = 8, 32          # batch of 8 samples, 32 classes
    TRAIN_SIZE = 1000     # deterministic "parameter" of the module

    logits = jax.random.normal(k1, (N, C), dtype=jnp.float32)
    log_probs = jax.nn.log_softmax(logits, axis=-1)          # NLLLoss expects log-probs
    target = jax.random.randint(k2, (N,), 0, C, dtype=jnp.int32)
    kl = jnp.abs(jax.random.normal(k3, (), dtype=jnp.float32))

    likelihood_loss, kl_loss = elbo_forward(
        log_probs, target, kl, kl_weight=0.1, train_size=TRAIN_SIZE)
    jax.block_until_ready((likelihood_loss, kl_loss))

    # Pure-JAX reference check of the hot path.
    ref_nll = -jnp.mean(log_probs[jnp.arange(N), target]) * TRAIN_SIZE
    ref_kl = 0.1 * kl
    assert jnp.allclose(likelihood_loss, ref_nll, rtol=1e-5, atol=1e-5), (
        likelihood_loss, ref_nll)
    assert jnp.allclose(kl_loss, ref_kl, rtol=1e-6, atol=1e-6)

    print("KERNEL_OK")
</pallas_src>

<mosaic_0001>
module attributes {stable_mosaic.version = 11 : i64} {
  func.func @_nll_sum_kernel(%arg0: i32, %arg1: i32, %arg2: memref<8x32xf32, #tpu.memory_space<vmem>>, %arg3: memref<8x1xi32, #tpu.memory_space<vmem>>, %arg4: memref<1x8x128xf32, #tpu.memory_space<vmem>>, %arg5: memref<8x128xf32, #tpu.memory_space<vmem>>) attributes {dimension_semantics = [#tpu.dimension_semantics<parallel>, #tpu.dimension_semantics<arbitrary>], iteration_bounds = array<i64: 2, 1>, scalar_prefetch = 0 : i64, scratch_operands = 1 : i64, tpu.core_type = #tpu.core_type<tc>, window_params = [{transform_indices = @transform_0, window_bounds = array<i64: 8, 32>}, {transform_indices = @transform_1, window_bounds = array<i64: 8, 1>}, {transform_indices = @transform_2, window_bounds = array<i64: 1, 8, 128>}]} {
    %c0_i32 = arith.constant 0 : i32
    %0 = arith.cmpi eq, %arg1, %c0_i32 : i32
    %1 = arith.extui %0 : i1 to i32
    %c0_i32_0 = arith.constant 0 : i32
    %2 = arith.cmpi ne, %1, %c0_i32_0 : i32
    scf.if %2 {
      %cst_12 = arith.constant 0.000000e+00 : f32
      %30 = vector.broadcast %cst_12 : f32 to vector<8x128xf32>
      %c0_13 = arith.constant 0 : index
      %c0_14 = arith.constant 0 : index
      %31 = vector.load %arg5[%c0_13, %c0_14] : memref<8x128xf32, #tpu.memory_space<vmem>>, vector<8x128xf32>
      tpu.vector_store %arg5[%c0_13, %c0_14], %30 {strides = array<i32>} : memref<8x128xf32, #tpu.memory_space<vmem>>, vector<8x128xf32>,
    } else {
    }
    %c0 = arith.constant 0 : index
    %c0_1 = arith.constant 0 : index
    %3 = vector.load %arg2[%c0, %c0_1] : memref<8x32xf32, #tpu.memory_space<vmem>>, vector<8x32xf32>
    %c0_2 = arith.constant 0 : index
    %c0_3 = arith.constant 0 : index
    %4 = vector.load %arg3[%c0_2, %c0_3] : memref<8x1xi32, #tpu.memory_space<vmem>>, vector<8x1xi32>
    %5 = tpu.iota {dimensions = array<i32: 1>} : vector<8x32xi32>
    %6 = tpu.iota {dimensions = array<i32: 0>} : vector<8x32xi32>
    %c1_i32 = arith.constant 1 : i32
    %7 = arith.muli %arg0, %c1_i32 : i32
    %8 = arith.addi %7, %arg1 : i32
    %c8_i32 = arith.constant 8 : i32
    %9 = arith.muli %8, %c8_i32 : i32
    %10 = vector.broadcast %9 : i32 to vector<8x32xi32>
    %11 = arith.addi %10, %6 : vector<8x32xi32>
    %c8_i32_4 = arith.constant 8 : i32
    %12 = vector.broadcast %c8_i32_4 : i32 to vector<8x32xi32>
    %13 = arith.cmpi slt, %11, %12 : vector<8x32xi32>
    %14 = vector.broadcast %4 : vector<8x1xi32> to vector<8x32xi32>
    %15 = arith.cmpi eq, %5, %14 : vector<8x32xi32>
    %16 = arith.andi %13, %15 : vector<8x32xi1>
    %c0_5 = arith.constant 0 : index
    %c0_6 = arith.constant 0 : index
    %17 = vector.load %arg5[%c0_5, %c0_6] : memref<8x128xf32, #tpu.memory_space<vmem>>, vector<8x128xf32>
    %cst = arith.constant 0.000000e+00 : f32
    %18 = vector.broadcast %cst : f32 to vector<8x32xf32>
    %19 = arith.select %16, %3, %18 : vector<8x32xi1>, vector<8x32xf32>
    %20 = vector.shape_cast %19 : vector<8x32xf32> to vector<1x8x32xf32>
    %cst_7 = arith.constant dense<0.000000e+00> : vector<1xf32>
    %21 = vector.multi_reduction <add>, %20, %cst_7 [1, 2] : vector<1x8x32xf32> to vector<1xf32>
    %22 = vector.shape_cast %21 : vector<1xf32> to vector<1x1x1xf32>
    %23 = vector.extract %22[0, 0, 0] : f32 from vector<1x1x1xf32>
    %24 = vector.broadcast %23 : f32 to vector<8x128xf32>
    %25 = arith.addf %17, %24 : vector<8x128xf32>
    %c0_8 = arith.constant 0 : index
    %c0_9 = arith.constant 0 : index
    %26 = vector.load %arg5[%c0_8, %c0_9] : memref<8x128xf32, #tpu.memory_space<vmem>>, vector<8x128xf32>
    tpu.vector_store %arg5[%c0_8, %c0_9], %25 {strides = array<i32>} : memref<8x128xf32, #tpu.memory_space<vmem>>, vector<8x128xf32>,
    %c0_i32_10 = arith.constant 0 : i32
    %27 = arith.cmpi eq, %arg1, %c0_i32_10 : i32
    %28 = arith.extui %27 : i1 to i32
    %c0_i32_11 = arith.constant 0 : i32
    %29 = arith.cmpi ne, %28, %c0_i32_11 : i32
    scf.if %29 {
      %c0_12 = arith.constant 0 : index
      %c0_13 = arith.constant 0 : index
      %30 = vector.load %arg5[%c0_12, %c0_13] : memref<8x128xf32, #tpu.memory_space<vmem>>, vector<8x128xf32>
      %31 = vector.shape_cast %30 : vector<8x128xf32> to vector<1x8x128xf32>
      %c0_14 = arith.constant 0 : index
      %c0_15 = arith.constant 0 : index
      %c0_16 = arith.constant 0 : index
      %32 = vector.load %arg4[%c0_14, %c0_15, %c0_16] : memref<1x8x128xf32, #tpu.memory_space<vmem>>, vector<1x8x128xf32>
      tpu.vector_store %arg4[%c0_14, %c0_15, %c0_16], %31 {strides = array<i32>} : memref<1x8x128xf32, #tpu.memory_space<vmem>>, vector<1x8x128xf32>,
    } else {
    }
    return
  }
  func.func @transform_0(%arg0: i32, %arg1: i32) -> (i32, i32) {
    %c1_i32 = arith.constant 1 : i32
    %0 = arith.muli %arg0, %c1_i32 : i32
    %1 = arith.addi %0, %arg1 : i32
    %c0_i32 = arith.constant 0 : i32
    %2 = arith.minsi %1, %c0_i32 : i32
    %c0_i32_0 = arith.constant 0 : i32
    %c0_i32_1 = arith.constant 0 : i32
    return %2, %c0_i32_0 : i32, i32
  }
  func.func @transform_1(%arg0: i32, %arg1: i32) -> (i32, i32) {
    %c1_i32 = arith.constant 1 : i32
    %0 = arith.muli %arg0, %c1_i32 : i32
    %1 = arith.addi %0, %arg1 : i32
    %c0_i32 = arith.constant 0 : i32
    %2 = arith.minsi %1, %c0_i32 : i32
    %c0_i32_0 = arith.constant 0 : i32
    %c0_i32_1 = arith.constant 0 : i32
    return %2, %c0_i32_0 : i32, i32
  }
  func.func @transform_2(%arg0: i32, %arg1: i32) -> (i32, i32, i32) {
    %c0_i32 = arith.constant 0 : i32
    %c0_i32_0 = arith.constant 0 : i32
    %c0_i32_1 = arith.constant 0 : i32
    return %arg0, %c0_i32, %c0_i32_0 : i32, i32, i32
  }
}

</mosaic_0001>

<bundles_post_ra>
// kernel: tpu_custom_call.1
= control target key start
LH: loop header
LB: loop body
LE: loop exit
PB: predicated region body
PF: predicated region fallthrough
CT: control target
= control target key end

     0   :  { %7 = vsyncpa [#allocation4], 0  ;;  %s627_s0 = inlined_call_operand.vmem [shape: f32[8,32], index: 0, kind: input, shape index: {}]   ;;  %s628_s1 = inlined_call_operand.vmem [shape: s32[8,1], index: 1, kind: input, shape index: {}]   ;;  %s629_s2 = inlined_call_operand.hbm [shape: f32[2,8,128], index: 2, kind: output, shape index: {}]  }
   0x1   :  { %9 = vsyncpa [#allocation4 + $0x1], 0  ;;  %s518_s9 = smov 0   ;;  %s520_s10 = smov 0  }
   0x2   :  { %s522_s11 = smov 0   ;;  %s524_s12 = smov 0  }
   0x3   :  { %s526_s13 = smov 0   ;;  %s528_s14 = smov 0  }
   0x4 LB: > { %s345_s15 = sadd.s32 4294967295, %s499_s14   ;;  %s346_s16 = sadd.s32 4294967294, %s499_s14   ;;  %s499_s14 = sphi %s528_s14, %s15_s14   ;;  %s495_s13 = sphi %s526_s13, %s636_s13   ;;  %s491_s12 = sphi %s524_s12, %s635_s12   ;;  %s487_s11 = sphi %s522_s11, %s634_s11   ;;  %s483_s10 = sphi %s520_s10, %s633_s10   ;;  %s479_s9 = sphi %s518_s9, %s632_s9  }
   0x5   : > { %s27_s17 = sadd.s32 1, %s495_s13  ;;  %s98_s18 = sadd.s32 1, %s487_s11 }
   0x6   : > { %p29_p0 = scmp.ge.s32.totalorder %s27_s17, 2  ;;  %p108_p1 = scmp.ne.s32.totalorder %s487_s11, %s483_s10 }
   0x7   : > { %p109_p2 = scmp.eq.s32.totalorder %s345_s15, 1  ;;  %p114_p3 = scmp.ne.s32.totalorder %s483_s10, %s479_s9 }
   0x8   : > { %s638_s17 = smov (%p29_p0, %s27_s17), 0  ;;  %p115_p5 = scmp.eq.s32.totalorder %s346_s16, 1 }
   0x9   : > { %p558_p4 = por %p109_p2, %p108_p1  ;;  %s95_s20 = ssub.s32 %s495_s13, %s638_s17 }
   0xa   : > { %p349_p6 = scmp.ge.s32.totalorder %s499_s14, 1  ;;  %p96_p7 = scmp.eq.s32.totalorder %s95_s20, 0 }
   0xb   : > { %p565_p8 = por %p115_p5, %p114_p3  ;;  %p159_p9 = scmp.lt.s32.totalorder %s499_s14, 3 }
   0xc   : > { %s571_s22 = scalar_select %p96_p7, %s487_s11, %s98_s18  }
   0xd   : > { %p160_p10 = pnand %p349_p6, %p159_p9 }
   0xe   : > { %p191_p11 = scmp.lt.s32.totalorder (!%p160_p10), %s491_s12, 0  ;;  %s359_s28 = sshll.u32 (!%p160_p10), %s491_s12, 3 }
   0xf   : > { %163 = sbr.rel (%p160_p10) target bundleno = 368 (0x170), region = 28  ;;  %s187_s4 = sand.u32 (!%p160_p10), 1, %s483_s10  }
  0x10   : > { %s350_s5 = sshll.u32 (!%p160_p10), %s187_s4, 3  ;;  %s361_s8 = sshll.u32 (!%p160_p10), %s491_s12, 7 }
  0x11   : > { %s189_s6 = scalar_lea.vmem (!%p160_p10), [#allocation3], %s350_s5  ;;  %s264_s20 = scalar_lea.hbm (!%p160_p10), %s629_s2, %s361_s8 }
  0x12   : > { %s266_s7 = sshll.u32 (!%p160_p10), %s189_s6, 4  ;;  %s502_s25 = smov (!%p160_p10), [#allocation3]   ;;  %s584_s7 = int_to_ptr.vmem [resolvable:$true] %s266_s7 }
  0x14   : > { %v501_v0 = vmov 0   ;;  %s192_s23 = scalar_select %p191_p11, %s491_s12, 0  ;;  %v217_v2 = vlaneseq  ;;  %v223_v4 = vstv %s359_s28  ;;  %vm233_vm2 = vcmask 261120  }
  0x15   : > { %422 = vset.pattern.permute.xlu0 %v501_v0  ;;  %s427_s12 = sshll.u32 %s502_s25, 4  ;;  %s428_s12 = int_to_ptr.vmem [resolvable:$false] %s427_s12 }
  0x16   : > { %s640_s23 = smov (!%p191_p11, %s192_s23), 0  ;;  %v220_v3 = vshrl.u32 %v217_v2, 7  ;;  %v218_v6 = vand.u32 127, %v217_v2  ;;  %s429_s26 = scalar_lea.vmem %s428_s12, 256 }
  0x17   : > { %s354_s24 = sshll.u32 %s640_s23, 3  ;;  %s253_s23 = scalar_lea.sflag [#allocation4], %s187_s4 }
  0x18   : > { %s206_s27 = scalar_lea.vmem %s628_s1, %s354_s24  ;;  %v224_v5 = vadd.s32 %v223_v4, %v220_v3  ;;  %s196_s3 = scalar_lea.vmem %s627_s0, %s354_s24 }
  0x19   : > { %v216_v1 = vld [vmem:[%s206_s27] sm:$0xff]  ;;  %s423_s24 = scalar_lea.vmem %s584_s7, 128  ;;  %p430_p1 = scmp.lt.s32.totalorder %s584_s7, %s428_s12 }
  0x1a   : > { %227 = vperm.xlu0 %422, %v216_v1   ;;  %vm225_vm0 = vcmp.lt.s32.totalorder %v224_v5, 8  ;;  %v215_v8 = vld [vmem:[%s196_s3] sm:$0xff]  ;;  %p424_p12 = scmp.ne.s32.totalorder %s584_s7, %s423_s24  ;;  %p431_p2 = scmp.lt.s32.totalorder %s429_s26, %s423_s24 }
  0x1c   : > { %p425_p13 = pnand %p424_p12, %p558_p4  ;;  %p432_p3 = por %p431_p2, %p430_p1 }
  0x1e   : > { %p426_p0 = pneg %p425_p13 }
  0x20   : > { %p433_p5 = pnand %p432_p3, %p426_p0 }
  0x95   : > { %v228_v7 = vpop.permute.xlu0 %227 }
  0x96   : > { %vm229_vm1 = vcmp.eq.s32.totalorder %v218_v6, %v228_v7 }
  0x97   : > { %vm230_vm3 = vmand %vm225_vm0, %vm229_vm1 }
  0x98   : > { %v232_v9 = vsel %vm230_vm3, %v215_v8, 0.0 }
  0x99   : > { %v234_v10 = vsel %vm233_vm2, %v232_v9, 0.0 }
  0x9a   : > { %235 = vadd.xlane.f32.xlu0 %v234_v10 }
 0x123   : > { %v236_v11 = vpop.xlane.xlu0 %235 }
 0x124   : > { %v237_v12 = vrot.slane %v236_v11, 4 }
 0x126   : > { %v238_v13 = vadd.f32 %v237_v12, %v236_v11 }
 0x128   : > { %v239_v14 = vrot.slane %v238_v13, 2 }
 0x12a   : > { %v240_v15 = vadd.f32 %v239_v14, %v238_v13 }
 0x12c   : > { %v241_v16 = vrot.slane %v240_v15, 1 }
 0x12e   : > { %v242_v17 = vadd.f32 %v241_v16, %v240_v15 }
 0x130   : > { %364 = vpush %v242_v17 }
 0x161   : > { %s365_s15 = spop %364 }
 0x162   : > { %v244_v18 = vstv %s365_s15 }
 0x163   : > { %251 = vst [vmem:[%s189_s6] sm:$0xff] %v244_v18 }
 0x164   : > { %436 = shalt.err (!%p433_p5)
}
 0x165   : > { %s437_s27 = scalar_lea.hbm %s264_s20, 128  ;;  %s441_s30 = scalar_lea.hbm %s629_s2, 256 }
 0x166   : > { %p438_p6 = scmp.ne.s32.totalorder %s264_s20, %s437_s27  ;;  %p442_p10 = scmp.lt.s32.totalorder %s264_s20, %s629_s2 }
 0x167   : > { %p443_p11 = scmp.lt.s32.totalorder %s441_s30, %s437_s27 }
 0x168   : > { %p439_p7 = pnand %p438_p6, %p558_p4 }
 0x169   : > { %p444_p12 = por %p443_p11, %p442_p10 }
 0x16a   : > { %p440_p9 = pneg %p439_p7 }
 0x16c   : > { %p445_p13 = pnand %p444_p12, %p440_p9 }
 0x16e   : > { %448 = shalt.err (!%p445_p13)
}
 0x16f   : > { %366 = dma.vmem_to_hbm [thread:$0]  (%p558_p4), %s584_s7, 128, %s264_s20, %s253_s23  }
 0x170 PF: > { %p372_p0 = scmp.ge.s32.totalorder %s499_s14, 2  ;;  %s278_s5 = sand.u32 1, %s479_s9  }
 0x171   : > { %s279_s6 = scalar_lea.sflag [#allocation4], %s278_s5 }
 0x172   : > { %p369_p1 = pnand %p372_p0, %p565_p8 }
 0x174   : > { %p370_p2 = pneg %p369_p1 }
 0x176   : > { %474 = dma.done.wait (%p370_p2), %s279_s6, 128  }
 0x177   : > { %476 = vsyncadd (%p370_p2), %s279_s6, 4294967168  ;;  %s15_s14 = sadd.s32 1, %s499_s14   ;;  %s632_s9 = smov %s483_s10 }
 0x178   : > { %p12_p3 = scmp.ge.s32.totalorder %s15_s14, 4   ;;  %s633_s10 = smov %s487_s11 }
 0x179   : > { %s634_s11 = smov %s571_s22  ;;  %s635_s12 = smov %s495_s13 }
 0x17a   : > { %s636_s13 = smov %s638_s17  ;;  %14 = sbr.rel (!%p12_p3) target bundleno = 4 (0x4), region = 74 }
 0x17f   :  { %284 = vsyncpa [#allocation4], 1 }
 0x180   :  { %286 = vsyncpa [#allocation4 + $0x1], 1 }

</bundles_post_ra>
